<compile_context>
chip_gen: v7x
topology: tpu7x:2x2x1
jax: 0.10.0
libtpu: 0.0.40
codegen_flags: <defaults>
</compile_context>

<pallas_src>
import functools

import jax
import jax.numpy as jnp
from jax.experimental import pallas as pl
from jax.experimental.pallas import tpu as pltpu


def _round_up(v, m):
    return (v + m - 1) // m * m


def _mlp_kernel(x_ref, w1_ref, b1_ref, w2_ref, b2_ref, o_ref):
    # fc1: (bn, in_size) @ (in_size, hidden_pad) + (1, hidden_pad)
    h = jnp.dot(x_ref[...], w1_ref[...], preferred_element_type=jnp.float32)
    h = h + b1_ref[...]
    # ReLU on the f32 accumulator (lane-dense since hidden is 128-padded).
    h = jnp.maximum(h, 0.0)
    # fc2: (bn, hidden_pad) @ (hidden_pad, out_pad) + (1, out_pad)
    y = jnp.dot(h.astype(w2_ref.dtype), w2_ref[...],
                preferred_element_type=jnp.float32)
    y = y + b2_ref[...]
    o_ref[...] = y.astype(o_ref.dtype)


@functools.partial(jax.jit, static_argnames=("block_n",))
def neuralnet_forward(x, w1, b1, w2, b2, *, block_n=512):
    """Forward pass of NeuralNet: fc2(relu(fc1(x))).

    x:  (N, in_size)
    w1: (in_size, hidden)   b1: (1, hidden)
    w2: (hidden, out_size)  b2: (1, out_size)
    returns (N, out_size)
    """
    n, in_size = x.shape
    hidden = w1.shape[1]
    out_size = w2.shape[1]
    dtype = x.dtype

    # --- lane-dense padding of hidden / output dims (multiples of 128) ------
    hp = _round_up(hidden, 128)
    op = _round_up(out_size, 128)
    w1p = jnp.pad(w1, ((0, 0), (0, hp - hidden)))           # zero cols -> h_pad = 0
    b1p = jnp.pad(b1, ((0, 0), (0, hp - hidden)))           # zero bias  -> relu(0) = 0
    w2p = jnp.pad(w2, ((0, hp - hidden), (0, op - out_size)))  # zero rows/cols
    b2p = jnp.pad(b2, ((0, 0), (0, op - out_size)))

    # --- batch tiling: big tiles, any N (no divisibility assert) ------------
    bn = _round_up(min(block_n, _round_up(n, 8)), 8)
    n_pad = _round_up(n, bn)
    xp = jnp.pad(x, ((0, n_pad - n), (0, 0))) if n_pad != n else x
    grid = (n_pad // bn,)

    # --- advisory cost estimate for XLA scheduling ---------------------------
    itemsize = jnp.dtype(dtype).itemsize
    cost = pl.CostEstimate(
        flops=2 * n_pad * (in_size * hp + hp * op),
        transcendentals=0,
        bytes_accessed=(xp.size + w1p.size + b1p.size + w2p.size + b2p.size
                        + n_pad * op) * itemsize,
    )

    y = pl.pallas_call(
        _mlp_kernel,
        out_shape=jax.ShapeDtypeStruct((n_pad, op), dtype),
        grid_spec=pltpu.PrefetchScalarGridSpec(
            num_scalar_prefetch=0,
            grid=grid,
            in_specs=[
                pl.BlockSpec((bn, in_size), lambda i: (i, 0)),  # x tile (streamed)
                pl.BlockSpec((in_size, hp), lambda i: (0, 0)),  # W1 (resident)
                pl.BlockSpec((1, hp), lambda i: (0, 0)),        # b1 (resident)
                pl.BlockSpec((hp, op), lambda i: (0, 0)),       # W2 (resident)
                pl.BlockSpec((1, op), lambda i: (0, 0)),        # b2 (resident)
            ],
            out_specs=pl.BlockSpec((bn, op), lambda i: (i, 0)),  # lane-dense out
        ),
        compiler_params=pltpu.CompilerParams(
            dimension_semantics=("parallel",)),
        cost_estimate=cost,
    )(xp, w1p, b1p, w2p, b2p)

    # Strip batch padding and the zero-padded output columns.
    return y[:n, :out_size]


def init_params(key, in_size, hidden, out_size, dtype=jnp.float32):
    """Kaiming-He-uniform-style weight init (like nn.Linear); biases = 0."""
    k1, k2 = jax.random.split(key)
    bound1 = 1.0 / jnp.sqrt(in_size)
    bound2 = 1.0 / jnp.sqrt(hidden)
    # Stored transposed relative to PyTorch's (out_features, in_features).
    w1 = jax.random.uniform(k1, (in_size, hidden), dtype, -bound1, bound1)
    b1 = jnp.zeros((1, hidden), dtype)
    w2 = jax.random.uniform(k2, (hidden, out_size), dtype, -bound2, bound2)
    b2 = jnp.zeros((1, out_size), dtype)
    return w1, b1, w2, b2


if __name__ == "__main__":
    # Small shapes consistent with the module: (N, in_size) -> 32 -> out_size
    N, IN_SIZE, HIDDEN, OUT_SIZE = 8, 64, 32, 4

    key = jax.random.PRNGKey(0)
    kx, kp = jax.random.split(key)
    x = jax.random.normal(kx, (N, IN_SIZE), jnp.float32)
    w1, b1, w2, b2 = init_params(kp, IN_SIZE, HIDDEN, OUT_SIZE)

    y = neuralnet_forward(x, w1, b1, w2, b2)   # block_n auto-clamps for tiny N
    y = jax.block_until_ready(y)

    # Reference check in plain JAX (same math as the PyTorch forward).
    y_ref = jnp.maximum(x @ w1 + b1, 0.0) @ w2 + b2
    assert y.shape == (N, OUT_SIZE)
    assert jnp.allclose(y, y_ref, atol=1e-5, rtol=1e-5)

    print("KERNEL_OK")
</pallas_src>

<mosaic_0001>
module attributes {stable_mosaic.version = 11 : i64} {
  func.func @_mlp_kernel(%arg0: i32, %arg1: memref<8x64xf32, #tpu.memory_space<vmem>>, %arg2: memref<64x128xf32, #tpu.memory_space<vmem>>, %arg3: memref<1x128xf32, #tpu.memory_space<vmem>>, %arg4: memref<128x128xf32, #tpu.memory_space<vmem>>, %arg5: memref<1x128xf32, #tpu.memory_space<vmem>>, %arg6: memref<8x128xf32, #tpu.memory_space<vmem>>) attributes {dimension_semantics = [#tpu.dimension_semantics<parallel>], iteration_bounds = array<i64: 1>, scalar_prefetch = 0 : i64, scratch_operands = 0 : i64, tpu.core_type = #tpu.core_type<tc>, window_params = [{transform_indices = @transform_0, window_bounds = array<i64: 8, 64>}, {pipeline_mode = #tpu.pipeline_mode<synchronous>, transform_indices = @transform_1, window_bounds = array<i64: 64, 128>}, {pipeline_mode = #tpu.pipeline_mode<synchronous>, transform_indices = @transform_2, window_bounds = array<i64: 1, 128>}, {pipeline_mode = #tpu.pipeline_mode<synchronous>, transform_indices = @transform_3, window_bounds = array<i64: 128, 128>}, {pipeline_mode = #tpu.pipeline_mode<synchronous>, transform_indices = @transform_4, window_bounds = array<i64: 1, 128>}, {transform_indices = @transform_5, window_bounds = array<i64: 8, 128>}]} {
    %c0 = arith.constant 0 : index
    %c0_0 = arith.constant 0 : index
    %0 = vector.load %arg1[%c0, %c0_0] : memref<8x64xf32, #tpu.memory_space<vmem>>, vector<8x64xf32>
    %c0_1 = arith.constant 0 : index
    %c0_2 = arith.constant 0 : index
    %1 = vector.load %arg2[%c0_1, %c0_2] : memref<64x128xf32, #tpu.memory_space<vmem>>, vector<64x128xf32>
    %cst = arith.constant dense<0.000000e+00> : vector<8x128xf32>
    %2 = tpu.matmul %0, %1, %cst {dimension_numbers = #tpu.dot_dimension_numbers<[1], [0], [0], [1], [0, 0, 1, 1], [], []>} : vector<8x64xf32>, vector<64x128xf32>, vector<8x128xf32> -> vector<8x128xf32>
    %c0_3 = arith.constant 0 : index
    %c0_4 = arith.constant 0 : index
    %3 = vector.load %arg3[%c0_3, %c0_4] : memref<1x128xf32, #tpu.memory_space<vmem>>, vector<1x128xf32>
    %4 = vector.broadcast %3 : vector<1x128xf32> to vector<8x128xf32>
    %5 = arith.addf %2, %4 : vector<8x128xf32>
    %cst_5 = arith.constant 0.000000e+00 : f32
    %6 = vector.broadcast %cst_5 : f32 to vector<8x128xf32>
    %7 = arith.maximumf %5, %6 : vector<8x128xf32>
    %c0_6 = arith.constant 0 : index
    %c0_7 = arith.constant 0 : index
    %8 = vector.load %arg4[%c0_6, %c0_7] : memref<128x128xf32, #tpu.memory_space<vmem>>, vector<128x128xf32>
    %cst_8 = arith.constant dense<0.000000e+00> : vector<8x128xf32>
    %9 = tpu.matmul %7, %8, %cst_8 {dimension_numbers = #tpu.dot_dimension_numbers<[1], [0], [0], [1], [0, 0, 1, 1], [], []>} : vector<8x128xf32>, vector<128x128xf32>, vector<8x128xf32> -> vector<8x128xf32>
    %c0_9 = arith.constant 0 : index
    %c0_10 = arith.constant 0 : index
    %10 = vector.load %arg5[%c0_9, %c0_10] : memref<1x128xf32, #tpu.memory_space<vmem>>, vector<1x128xf32>
    %11 = vector.broadcast %10 : vector<1x128xf32> to vector<8x128xf32>
    %12 = arith.addf %9, %11 : vector<8x128xf32>
    %c0_11 = arith.constant 0 : index
    %c0_12 = arith.constant 0 : index
    %13 = vector.load %arg6[%c0_11, %c0_12] : memref<8x128xf32, #tpu.memory_space<vmem>>, vector<8x128xf32>
    tpu.vector_store %arg6[%c0_11, %c0_12], %12 {strides = array<i32>} : memref<8x128xf32, #tpu.memory_space<vmem>>, vector<8x128xf32>,
    return
  }
  func.func @transform_0(%arg0: i32) -> (i32, i32) {
    %c0_i32 = arith.constant 0 : i32
    %c0_i32_0 = arith.constant 0 : i32
    return %arg0, %c0_i32 : i32, i32
  }
  func.func @transform_1(%arg0: i32) -> (i32, i32) {
    %c0_i32 = arith.constant 0 : i32
    %c0_i32_0 = arith.constant 0 : i32
    %c0_i32_1 = arith.constant 0 : i32
    return %c0_i32, %c0_i32_0 : i32, i32
  }
  func.func @transform_2(%arg0: i32) -> (i32, i32) {
    %c0_i32 = arith.constant 0 : i32
    %c0_i32_0 = arith.constant 0 : i32
    %c0_i32_1 = arith.constant 0 : i32
    return %c0_i32, %c0_i32_0 : i32, i32
  }
  func.func @transform_3(%arg0: i32) -> (i32, i32) {
    %c0_i32 = arith.constant 0 : i32
    %c0_i32_0 = arith.constant 0 : i32
    %c0_i32_1 = arith.constant 0 : i32
    return %c0_i32, %c0_i32_0 : i32, i32
  }
  func.func @transform_4(%arg0: i32) -> (i32, i32) {
    %c0_i32 = arith.constant 0 : i32
    %c0_i32_0 = arith.constant 0 : i32
    %c0_i32_1 = arith.constant 0 : i32
    return %c0_i32, %c0_i32_0 : i32, i32
  }
  func.func @transform_5(%arg0: i32) -> (i32, i32) {
    %c0_i32 = arith.constant 0 : i32
    %c0_i32_0 = arith.constant 0 : i32
    return %arg0, %c0_i32 : i32, i32
  }
}

</mosaic_0001>

<bundles_post_ra>
// kernel: neuralnet_forward.1
= control target key start
LH: loop header
LB: loop body
LE: loop exit
PB: predicated region body
PF: predicated region fallthrough
CT: control target
= control target key end

     0   :  { %v331_v0 = vmov 0.0|0.0   ;;  %vm332_vm0 = vmmov 0   ;;  %v333_v4 = vmov 0.0   ;;  %vm36_vm1 = vcmask 523264   ;;  %s460_s1 = inlined_call_operand.vmem [shape: f32[64,128], index: 1, kind: input, shape index: {}]   ;;  %s461_s3 = inlined_call_operand.vmem [shape: f32[128,128], index: 3, kind: input, shape index: {}]   ;;  %s462_s0 = inlined_call_operand.vmem [shape: f32[8,64], index: 0, kind: input, shape index: {}]   ;;  %s463_s2 = inlined_call_operand.vmem [shape: f32[1,128], index: 2, kind: input, shape index: {}]   ;;  %s464_s4 = inlined_call_operand.vmem [shape: f32[1,128], index: 4, kind: input, shape index: {}]   ;;  %s465_s5 = inlined_call_operand.vmem [shape: f32[8,128], index: 5, kind: output, shape index: {}]  }
   0x1   :  { %292 = vmatprep.subr.bf16.mxu0 %v331_v0  ;;  %v21_v1 = vld [vmem:[%s460_s1] sm:$0xff]  ;;  %v22_v2 = vld [vmem:[%s460_s1 + $0x8] sm:$0xff]  ;;  %v23_v3 = vld [vmem:[%s460_s1 + $0x10] sm:$0xff]  ;;  %254 = vmatprep.mubr.msk.f32.mxu0 %vm332_vm0, %v333_v4 }
   0x2   :  { %v293_v5 = vpack.c.bf16 %v22_v2, %v21_v1  ;;  %v24_v6 = vld [vmem:[%s460_s1 + $0x18] sm:$0xff]  ;;  %304 = vmatprep.subr.bf16.mxu1 %v331_v0  ;;  %289 = vmatprep.mubr.msk.f32.mxu1 %vm332_vm0, %v333_v4  ;;  %v111_v8 = vld [vmem:[%s461_s3] sm:$0xff]  ;;  %v112_v9 = vld [vmem:[%s461_s3 + $0x8] sm:$0xff] }
   0x3   :  { %v296_v7 = vpack.c.bf16 %v24_v6, %v23_v3  ;;  %v113_v10 = vld [vmem:[%s461_s3 + $0x10] sm:$0xff]  ;;  %v25_v11 = vld [vmem:[%s460_s1 + $0x20] sm:$0xff]  ;;  %v26_v12 = vld [vmem:[%s460_s1 + $0x28] sm:$0xff]  ;;  %v305_v13 = vpack.c.bf16 %v112_v9, %v111_v8 }
   0x4   :  { %294 = vmatpush3.bf16.msra.mxu0 %v293_v5  ;;  %v114_v14 = vld [vmem:[%s461_s3 + $0x18] sm:$0xff]  ;;  %v299_v16 = vpack.c.bf16 %v26_v12, %v25_v11  ;;  %v115_v17 = vld [vmem:[%s461_s3 + $0x20] sm:$0xff]  ;;  %v116_v18 = vld [vmem:[%s461_s3 + $0x28] sm:$0xff] }
   0x5   :  { %295 = vmatprep.subr.bf16.mxu0 %v331_v0  ;;  %306 = vmatpush3.bf16.msra.mxu1 %v305_v13  ;;  %v308_v15 = vpack.c.bf16 %v114_v14, %v113_v10  ;;  %v27_v19 = vld [vmem:[%s460_s1 + $0x30] sm:$0xff]  ;;  %v28_v20 = vld [vmem:[%s460_s1 + $0x38] sm:$0xff]  ;;  %v311_v21 = vpack.c.bf16 %v116_v18, %v115_v17  ;;  %v20_v26 = vld [vmem:[%s462_s0] sm:$0xff] }
   0x6   :  { %307 = vmatprep.subr.bf16.mxu1 %v331_v0  ;;  %v302_v22 = vpack.c.bf16 %v28_v20, %v27_v19  ;;  %v117_v23 = vld [vmem:[%s461_s3 + $0x30] sm:$0xff]  ;;  %v118_v24 = vld [vmem:[%s461_s3 + $0x38] sm:$0xff]  ;;  %v119_v27 = vld [vmem:[%s461_s3 + $0x40] sm:$0xff] }
   0x7   :  { %v314_v25 = vpack.c.bf16 %v118_v24, %v117_v23  ;;  %v120_v28 = vld [vmem:[%s461_s3 + $0x48] sm:$0xff]  ;;  %v121_v30 = vld [vmem:[%s461_s3 + $0x50] sm:$0xff]  ;;  %v122_v31 = vld [vmem:[%s461_s3 + $0x58] sm:$0xff] }
   0x8   :  { %297 = vmatpush3.bf16.msra.mxu0 %v296_v7  ;;  %v317_v29 = vpack.c.bf16 %v120_v28, %v119_v27  ;;  %v320_v32 = vpack.c.bf16 %v122_v31, %v121_v30  ;;  %v123_v33 = vld [vmem:[%s461_s3 + $0x60] sm:$0xff]  ;;  %v124_v34 = vld [vmem:[%s461_s3 + $0x68] sm:$0xff]  ;;  %v125_v36 = vld [vmem:[%s461_s3 + $0x70] sm:$0xff] }
   0x9   :  { %298 = vmatprep.subr.bf16.mxu0 %v331_v0  ;;  %309 = vmatpush3.bf16.msra.mxu1 %v308_v15  ;;  %v323_v35 = vpack.c.bf16 %v124_v34, %v123_v33  ;;  %v126_v37 = vld [vmem:[%s461_s3 + $0x78] sm:$0xff]  ;;  %v209_v39 = vld [vmem:[%s463_s2] ss:$0 sm:$0xff] }
   0xa   :  { %310 = vmatprep.subr.bf16.mxu1 %v331_v0  ;;  %v326_v38 = vpack.c.bf16 %v126_v37, %v125_v36  ;;  %v211_v44 = vld [vmem:[%s464_s4] ss:$0 sm:$0xff] }
   0xc   :  { %300 = vmatpush3.bf16.msra.mxu0 %v299_v16 }
   0xd   :  { %301 = vmatprep.subr.bf16.mxu0 %v331_v0  ;;  %312 = vmatpush3.bf16.msra.mxu1 %v311_v21 }
   0xe   :  { %313 = vmatprep.subr.bf16.mxu1 %v331_v0 }
  0x10   :  { %303 = vmatpush3.bf16.msra.mxu0 %v302_v22 }
  0x11   :  { %315 = vmatpush3.bf16.msra.mxu1 %v314_v25 }
  0x12   :  { %316 = vmatprep.subr.bf16.mxu1 %v331_v0 }
  0x13   :  { %255 = vmatmul.mubr.msk.f32.vlgmr.msra.gmra.mrb[0].mxu0 %vm36_vm1, %v20_v26 }
  0x15   :  { %318 = vmatpush3.bf16.msra.mxu1 %v317_v29 }
  0x16   :  { %319 = vmatprep.subr.bf16.mxu1 %v331_v0 }
  0x19   :  { %321 = vmatpush3.bf16.msra.mxu1 %v320_v32 }
  0x1a   :  { %322 = vmatprep.subr.bf16.mxu1 %v331_v0 }
  0x1d   :  { %324 = vmatpush3.bf16.msra.mxu1 %v323_v35 }
  0x1e   :  { %325 = vmatprep.subr.bf16.mxu1 %v331_v0 }
  0x21   :  { %327 = vmatpush3.bf16.msra.mxu1 %v326_v38 }
  0xe6   :  { %v106_v40 = vpop.f32.mrb[0].mxu0 }
  0xe7   :  { %v107_v41 = vadd.f32 %v209_v39, %v106_v40  ;;  %v256_v42 = vpop.f32.mrb[1].mxu0 }
  0xe9   :  { %v110_v43 = vmax.f32 %v107_v41, 0.0 }
  0xeb   :  { %290 = vmatmul.mubr.f32.vlgmr.msra.gmra.mrb[0].mxu1 %v110_v43 }
 0x1be   :  { %v200_v45 = vpop.f32.mrb[0].mxu1 }
 0x1bf   :  { %v201_v46 = vadd.f32 %v211_v44, %v200_v45  ;;  %v291_v47 = vpop.f32.mrb[1].mxu1 }
 0x1c1   :  { %204 = vst [vmem:[%s465_s5] sm:$0xff] %v201_v46 }

</bundles_post_ra>
